<compile_context>
chip_gen: v6e
topology: v6e:2x2x1
jax: 0.10.0
libtpu: 0.0.40
codegen_flags: <defaults>
</compile_context>

<pallas_src>
import functools

import jax
import jax.numpy as jnp
from jax.experimental import pallas as pl
from jax.experimental.pallas import tpu as pltpu


def _round_up(n, m):
    return (n + m - 1) // m * m


def resmlp_kernel(x_ref, w_fused_ref, b_fused_ref, w_cm_ref, b_cm_ref,
                  w_cls_ref, b_cls_ref, o_ref, *, hp):
    """One batch tile: (TB, Dp) -> (TB, Cp). hp = padded hidden dim (static)."""
    # bf16 operands -> MXU fast path; f32 accumulation everywhere.
    x = x_ref[...].astype(jnp.bfloat16)

    # Fused token-mix + residual matmul: (TB, Dp) @ (Dp, 2*Hp).
    tr = jnp.dot(x, w_fused_ref[...], preferred_element_type=jnp.float32)
    tr = tr + b_fused_ref[...]                       # f32 bias add
    token = jnp.maximum(tr[:, :hp], 0.0)             # relu(token_mixing(x))
    resid = tr[:, hp:]                               # residual(x)  (no relu)

    # Channel mixing: (TB, Hp) @ (Hp, Hp) + bias -> relu.
    channel = jnp.dot(token.astype(jnp.bfloat16), w_cm_ref[...],
                      preferred_element_type=jnp.float32)
    channel = jnp.maximum(channel + b_cm_ref[...], 0.0)

    hidden = channel + resid                         # residual add (f32)

    # Classifier: (TB, Hp) @ (Hp, Cp) + bias.
    out = jnp.dot(hidden.astype(jnp.bfloat16), w_cls_ref[...],
                  preferred_element_type=jnp.float32)
    o_ref[...] = (out + b_cls_ref[...]).astype(o_ref.dtype)


def prepare_params(params):
    """Fuse token-mix + residual weights, pad all dims to 128 lanes, cast
    matmul weights to bf16 (biases stay f32). Done once, outside the kernel."""
    D, H = params["w_tm"].shape
    C = params["w_cls"].shape[1]
    Dp, Hp, Cp = _round_up(D, 128), _round_up(H, 128), _round_up(C, 128)

    def pad2(a, r, c):
        return jnp.pad(a, ((0, r - a.shape[0]), (0, c - a.shape[1])))

    w_fused = jnp.concatenate(
        [pad2(params["w_tm"], Dp, Hp), pad2(params["w_res"], Dp, Hp)],
        axis=1).astype(jnp.bfloat16)                         # (Dp, 2*Hp) bf16
    b_fused = jnp.concatenate(
        [pad2(params["b_tm"], 1, Hp), pad2(params["b_res"], 1, Hp)],
        axis=1)                                              # (1, 2*Hp) f32

    return dict(
        w_fused=w_fused, b_fused=b_fused,
        w_cm=pad2(params["w_cm"], Hp, Hp).astype(jnp.bfloat16),
        b_cm=pad2(params["b_cm"], 1, Hp),
        w_cls=pad2(params["w_cls"], Hp, Cp).astype(jnp.bfloat16),
        b_cls=pad2(params["b_cls"], 1, Cp),
        dims=(D, Hp, C, Dp, Cp),
    )


def resmlp_forward(x, prep):
    """x: (B, input_dim) f32. prep: output of prepare_params."""
    D, Hp, C, Dp, Cp = prep["dims"]
    B = x.shape[0]

    # Batch tile: lane-dense output, sublane-aligned batch.
    TB = 128 if B >= 128 else _round_up(B, 8)
    Bp = _round_up(B, TB)
    xp = jnp.pad(x, ((0, Bp - B), (0, Dp - D)))

    kernel = functools.partial(resmlp_kernel, hp=Hp)

    flops = 2 * Bp * (Dp * 2 * Hp + Hp * Hp + Hp * Cp)
    bytes_accessed = (
        xp.size * 4 + Bp * Cp * 4
        + prep["w_fused"].size * 2 + prep["b_fused"].size * 4
        + prep["w_cm"].size * 2 + prep["b_cm"].size * 4
        + prep["w_cls"].size * 2 + prep["b_cls"].size * 4)

    out_padded = pl.pallas_call(
        kernel,
        out_shape=jax.ShapeDtypeStruct((Bp, Cp), jnp.float32),
        grid=(Bp // TB,),
        in_specs=[
            pl.BlockSpec((TB, Dp), lambda i: (i, 0)),        # x tile (per step)
            pl.BlockSpec((Dp, 2 * Hp), lambda i: (0, 0)),    # weights/biases:
            pl.BlockSpec((1, 2 * Hp), lambda i: (0, 0)),     # constant index_map
            pl.BlockSpec((Hp, Hp), lambda i: (0, 0)),        # -> VMEM-resident
            pl.BlockSpec((1, Hp), lambda i: (0, 0)),         #    across the grid
            pl.BlockSpec((Hp, Cp), lambda i: (0, 0)),
            pl.BlockSpec((1, Cp), lambda i: (0, 0)),
        ],
        out_specs=pl.BlockSpec((TB, Cp), lambda i: (i, 0)),
        compiler_params=pltpu.CompilerParams(
            dimension_semantics=("parallel",)),
        cost_estimate=pl.CostEstimate(
            flops=flops, transcendentals=0, bytes_accessed=bytes_accessed),
    )(xp, prep["w_fused"], prep["b_fused"], prep["w_cm"], prep["b_cm"],
      prep["w_cls"], prep["b_cls"])

    return out_padded[:B, :C]


def init_params(key, input_dim, hidden_dim, num_classes):
    """Deterministic synthetic parameters (same shapes as the PyTorch module).
    nn.Linear stores weight as (out, in); we store the transpose (in, out)."""
    ks = jax.random.split(key, 8)

    def lin(kw, kb, fan_in, fan_out):
        bound = 1.0 / jnp.sqrt(fan_in)
        w = jax.random.uniform(kw, (fan_in, fan_out), jnp.float32, -bound, bound)
        b = jax.random.uniform(kb, (1, fan_out), jnp.float32, -bound, bound)
        return w, b

    w_tm, b_tm = lin(ks[0], ks[1], input_dim, hidden_dim)
    w_cm, b_cm = lin(ks[2], ks[3], hidden_dim, hidden_dim)
    w_res, b_res = lin(ks[4], ks[5], input_dim, hidden_dim)
    w_cls, b_cls = lin(ks[6], ks[7], hidden_dim, num_classes)
    return dict(w_tm=w_tm, b_tm=b_tm, w_cm=w_cm, b_cm=b_cm,
                w_res=w_res, b_res=b_res, w_cls=w_cls, b_cls=b_cls)


def resmlp_ref(x, p):
    """Pure-JAX reference mirroring the kernel's bf16-operand / f32-accumulate
    matmul numerics (elementwise math in f32)."""
    def mm(a, w):
        return jnp.dot(a.astype(jnp.bfloat16), w.astype(jnp.bfloat16),
                       preferred_element_type=jnp.float32)
    token = jax.nn.relu(mm(x, p["w_tm"]) + p["b_tm"])
    channel = jax.nn.relu(mm(token, p["w_cm"]) + p["b_cm"])
    hidden = channel + (mm(x, p["w_res"]) + p["b_res"])
    return mm(hidden, p["w_cls"]) + p["b_cls"]


if __name__ == "__main__":
    batch, input_dim, hidden_dim, num_classes = 8, 16, 32, 8

    key = jax.random.PRNGKey(0)
    kx, kp = jax.random.split(key)
    x = jax.random.normal(kx, (batch, input_dim), jnp.float32)
    params = init_params(kp, input_dim, hidden_dim, num_classes)

    prep = prepare_params(params)
    out = resmlp_forward(x, prep)
    out = jax.block_until_ready(out)

    ref = resmlp_ref(x, params)
    assert out.shape == (batch, num_classes)
    assert jnp.allclose(out, ref, atol=1e-3, rtol=1e-3), (
        f"max abs err {jnp.max(jnp.abs(out - ref))}")

    print("KERNEL_OK")
</pallas_src>

<mosaic_0001>
module attributes {stable_mosaic.version = 11 : i64} {
  func.func @resmlp_kernel(%arg0: i32, %arg1: memref<8x128xf32, #tpu.memory_space<vmem>>, %arg2: memref<128x256xbf16, #tpu.memory_space<vmem>>, %arg3: memref<1x256xf32, #tpu.memory_space<vmem>>, %arg4: memref<128x128xbf16, #tpu.memory_space<vmem>>, %arg5: memref<1x128xf32, #tpu.memory_space<vmem>>, %arg6: memref<128x128xbf16, #tpu.memory_space<vmem>>, %arg7: memref<1x128xf32, #tpu.memory_space<vmem>>, %arg8: memref<8x128xf32, #tpu.memory_space<vmem>>) attributes {dimension_semantics = [#tpu.dimension_semantics<parallel>], iteration_bounds = array<i64: 1>, scalar_prefetch = 0 : i64, scratch_operands = 0 : i64, tpu.core_type = #tpu.core_type<tc>, window_params = [{transform_indices = @transform_0, window_bounds = array<i64: 8, 128>}, {pipeline_mode = #tpu.pipeline_mode<synchronous>, transform_indices = @transform_1, window_bounds = array<i64: 128, 256>}, {pipeline_mode = #tpu.pipeline_mode<synchronous>, transform_indices = @transform_2, window_bounds = array<i64: 1, 256>}, {pipeline_mode = #tpu.pipeline_mode<synchronous>, transform_indices = @transform_3, window_bounds = array<i64: 128, 128>}, {pipeline_mode = #tpu.pipeline_mode<synchronous>, transform_indices = @transform_4, window_bounds = array<i64: 1, 128>}, {pipeline_mode = #tpu.pipeline_mode<synchronous>, transform_indices = @transform_5, window_bounds = array<i64: 128, 128>}, {pipeline_mode = #tpu.pipeline_mode<synchronous>, transform_indices = @transform_6, window_bounds = array<i64: 1, 128>}, {transform_indices = @transform_7, window_bounds = array<i64: 8, 128>}]} {
    %c0 = arith.constant 0 : index
    %c0_0 = arith.constant 0 : index
    %0 = vector.load %arg1[%c0, %c0_0] : memref<8x128xf32, #tpu.memory_space<vmem>>, vector<8x128xf32>
    %1 = arith.truncf %0 : vector<8x128xf32> to vector<8x128xbf16>
    %c0_1 = arith.constant 0 : index
    %c0_2 = arith.constant 0 : index
    %2 = vector.load %arg2[%c0_1, %c0_2] : memref<128x256xbf16, #tpu.memory_space<vmem>>, vector<128x256xbf16>
    %cst = arith.constant dense<0.000000e+00> : vector<8x256xf32>
    %3 = tpu.matmul %1, %2, %cst {dimension_numbers = #tpu.dot_dimension_numbers<[1], [0], [0], [1], [0, 0, 1, 1], [], []>} : vector<8x128xbf16>, vector<128x256xbf16>, vector<8x256xf32> -> vector<8x256xf32>
    %c0_3 = arith.constant 0 : index
    %c0_4 = arith.constant 0 : index
    %4 = vector.load %arg3[%c0_3, %c0_4] : memref<1x256xf32, #tpu.memory_space<vmem>>, vector<1x256xf32>
    %5 = vector.broadcast %4 : vector<1x256xf32> to vector<8x256xf32>
    %6 = arith.addf %3, %5 : vector<8x256xf32>
    %7 = vector.extract_strided_slice %6 {offsets = [0, 0], sizes = [8, 128], strides = [1, 1]} : vector<8x256xf32> to vector<8x128xf32>
    %cst_5 = arith.constant 0.000000e+00 : f32
    %8 = vector.broadcast %cst_5 : f32 to vector<8x128xf32>
    %9 = arith.maximumf %7, %8 : vector<8x128xf32>
    %10 = vector.extract_strided_slice %6 {offsets = [0, 128], sizes = [8, 128], strides = [1, 1]} : vector<8x256xf32> to vector<8x128xf32>
    %11 = arith.truncf %9 : vector<8x128xf32> to vector<8x128xbf16>
    %c0_6 = arith.constant 0 : index
    %c0_7 = arith.constant 0 : index
    %12 = vector.load %arg4[%c0_6, %c0_7] : memref<128x128xbf16, #tpu.memory_space<vmem>>, vector<128x128xbf16>
    %cst_8 = arith.constant dense<0.000000e+00> : vector<8x128xf32>
    %13 = tpu.matmul %11, %12, %cst_8 {dimension_numbers = #tpu.dot_dimension_numbers<[1], [0], [0], [1], [0, 0, 1, 1], [], []>} : vector<8x128xbf16>, vector<128x128xbf16>, vector<8x128xf32> -> vector<8x128xf32>
    %c0_9 = arith.constant 0 : index
    %c0_10 = arith.constant 0 : index
    %14 = vector.load %arg5[%c0_9, %c0_10] : memref<1x128xf32, #tpu.memory_space<vmem>>, vector<1x128xf32>
    %15 = vector.broadcast %14 : vector<1x128xf32> to vector<8x128xf32>
    %16 = arith.addf %13, %15 : vector<8x128xf32>
    %cst_11 = arith.constant 0.000000e+00 : f32
    %17 = vector.broadcast %cst_11 : f32 to vector<8x128xf32>
    %18 = arith.maximumf %16, %17 : vector<8x128xf32>
    %19 = arith.addf %18, %10 : vector<8x128xf32>
    %20 = arith.truncf %19 : vector<8x128xf32> to vector<8x128xbf16>
    %c0_12 = arith.constant 0 : index
    %c0_13 = arith.constant 0 : index
    %21 = vector.load %arg6[%c0_12, %c0_13] : memref<128x128xbf16, #tpu.memory_space<vmem>>, vector<128x128xbf16>
    %cst_14 = arith.constant dense<0.000000e+00> : vector<8x128xf32>
    %22 = tpu.matmul %20, %21, %cst_14 {dimension_numbers = #tpu.dot_dimension_numbers<[1], [0], [0], [1], [0, 0, 1, 1], [], []>} : vector<8x128xbf16>, vector<128x128xbf16>, vector<8x128xf32> -> vector<8x128xf32>
    %c0_15 = arith.constant 0 : index
    %c0_16 = arith.constant 0 : index
    %23 = vector.load %arg7[%c0_15, %c0_16] : memref<1x128xf32, #tpu.memory_space<vmem>>, vector<1x128xf32>
    %24 = vector.broadcast %23 : vector<1x128xf32> to vector<8x128xf32>
    %25 = arith.addf %22, %24 : vector<8x128xf32>
    %c0_17 = arith.constant 0 : index
    %c0_18 = arith.constant 0 : index
    %26 = vector.load %arg8[%c0_17, %c0_18] : memref<8x128xf32, #tpu.memory_space<vmem>>, vector<8x128xf32>
    tpu.vector_store %arg8[%c0_17, %c0_18], %25 {strides = array<i32>} : memref<8x128xf32, #tpu.memory_space<vmem>>, vector<8x128xf32>,
    return
  }
  func.func @transform_0(%arg0: i32) -> (i32, i32) {
    %c0_i32 = arith.constant 0 : i32
    %c0_i32_0 = arith.constant 0 : i32
    return %arg0, %c0_i32 : i32, i32
  }
  func.func @transform_1(%arg0: i32) -> (i32, i32) {
    %c0_i32 = arith.constant 0 : i32
    %c0_i32_0 = arith.constant 0 : i32
    %c0_i32_1 = arith.constant 0 : i32
    return %c0_i32, %c0_i32_0 : i32, i32
  }
  func.func @transform_2(%arg0: i32) -> (i32, i32) {
    %c0_i32 = arith.constant 0 : i32
    %c0_i32_0 = arith.constant 0 : i32
    %c0_i32_1 = arith.constant 0 : i32
    return %c0_i32, %c0_i32_0 : i32, i32
  }
  func.func @transform_3(%arg0: i32) -> (i32, i32) {
    %c0_i32 = arith.constant 0 : i32
    %c0_i32_0 = arith.constant 0 : i32
    %c0_i32_1 = arith.constant 0 : i32
    return %c0_i32, %c0_i32_0 : i32, i32
  }
  func.func @transform_4(%arg0: i32) -> (i32, i32) {
    %c0_i32 = arith.constant 0 : i32
    %c0_i32_0 = arith.constant 0 : i32
    %c0_i32_1 = arith.constant 0 : i32
    return %c0_i32, %c0_i32_0 : i32, i32
  }
  func.func @transform_5(%arg0: i32) -> (i32, i32) {
    %c0_i32 = arith.constant 0 : i32
    %c0_i32_0 = arith.constant 0 : i32
    %c0_i32_1 = arith.constant 0 : i32
    return %c0_i32, %c0_i32_0 : i32, i32
  }
  func.func @transform_6(%arg0: i32) -> (i32, i32) {
    %c0_i32 = arith.constant 0 : i32
    %c0_i32_0 = arith.constant 0 : i32
    %c0_i32_1 = arith.constant 0 : i32
    return %c0_i32, %c0_i32_0 : i32, i32
  }
  func.func @transform_7(%arg0: i32) -> (i32, i32) {
    %c0_i32 = arith.constant 0 : i32
    %c0_i32_0 = arith.constant 0 : i32
    return %arg0, %c0_i32 : i32, i32
  }
}

</mosaic_0001>

<bundles_post_ra>
// kernel: tpu_custom_call.1
= control target key start
LH: loop header
LB: loop body
LE: loop exit
PB: predicated region body
PF: predicated region fallthrough
CT: control target
= control target key end

     0   :  { %12 = vsyncpa [#allocation3], 0  ;;  %s823_s0 = inlined_call_operand.hbm [shape: f32[8,128], index: 0, kind: input, shape index: {}]   ;;  %s824_s1 = inlined_call_operand.hbm [shape: bf16[128,256], index: 1, kind: input, shape index: {}]   ;;  %s825_s2 = inlined_call_operand.vmem [shape: f32[1,256], index: 2, kind: input, shape index: {}]   ;;  %s826_s3 = inlined_call_operand.hbm [shape: bf16[128,128], index: 3, kind: input, shape index: {}]   ;;  %s827_s4 = inlined_call_operand.vmem [shape: f32[1,128], index: 4, kind: input, shape index: {}]   ;;  %s828_s5 = inlined_call_operand.hbm [shape: bf16[128,128], index: 5, kind: input, shape index: {}]   ;;  %s829_s6 = inlined_call_operand.vmem [shape: f32[1,128], index: 6, kind: input, shape index: {}]   ;;  %s830_s7 = inlined_call_operand.hbm [shape: f32[8,128], index: 7, kind: output, shape index: {}]  }
   0x1   :  { %13 = vsyncpa [#allocation6], 0 }
   0x2   :  { %14 = vsyncpa [#allocation9], 0 }
   0x3   :  { %15 = vsyncpa [#allocation4], 0  ;;  %s729_s24 = smov [#allocation5]  }
   0x4   :  { %s31_s25 = sshll.u32 %s729_s24, 4  ;;  %s32_s25 = int_to_ptr.vmem [resolvable:$true] %s31_s25 }
   0x5   :  { %s629_s26 = scalar_lea.vmem %s32_s25, 2048  ;;  %p634_p1 = scmp.lt.s32.totalorder %s32_s25, %s32_s25 }
   0x6   :  { %p630_p0 = scmp.ne.s32.totalorder %s32_s25, %s629_s26  ;;  %p635_p2 = scmp.lt.s32.totalorder %s629_s26, %s629_s26 }
   0x8   :  { %p636_p3 = por %p635_p2, %p634_p1 }
   0xa   :  { %p637_p4 = pnand %p636_p3, %p630_p0 }
   0xc   :  { %640 = shalt.err (!%p637_p4)
}
   0xd   :  { %s730_s27 = smov 128   ;;  %s731_s28 = smov 8  }
   0xe   :  { %37 = dma.hbm_to_vmem [thread:$0]  %s824_s1, 2048, %s32_s25, [#allocation6], %s730_s27, %s730_s27, %s731_s28  }
   0xf   :  { %s732_s8 = smov [#allocation2]   ;;  %s733_s10 = smov [#allocation7]  }
  0x10   :  { %s22_s9 = sshll.u32 %s732_s8, 4  ;;  %s45_s11 = sshll.u32 %s733_s10, 4  ;;  %s23_s9 = int_to_ptr.vmem [resolvable:$true] %s22_s9  ;;  %s46_s11 = int_to_ptr.vmem [resolvable:$true] %s45_s11 }
  0x11   :  { %s649_s12 = scalar_lea.vmem %s23_s9, 128  ;;  %p654_p6 = scmp.lt.s32.totalorder %s23_s9, %s23_s9 }
  0x12   :  { %p650_p5 = scmp.ne.s32.totalorder %s23_s9, %s649_s12  ;;  %p655_p7 = scmp.lt.s32.totalorder %s649_s12, %s649_s12 }
  0x14   :  { %p656_p8 = por %p655_p7, %p654_p6 }
  0x16   :  { %p657_p9 = pnand %p656_p8, %p650_p5 }
  0x18   :  { %660 = shalt.err (!%p657_p9)
}
  0x19   :  { %25 = dma.hbm_to_vmem [thread:$0]  %s823_s0, 128, %s23_s9, [#allocation3]  }
  0x1a   :  { %s669_s15 = scalar_lea.vmem %s46_s11, 1024  ;;  %p674_p11 = scmp.lt.s32.totalorder %s46_s11, %s46_s11 }
  0x1b   :  { %p670_p10 = scmp.ne.s32.totalorder %s46_s11, %s669_s15  ;;  %p675_p12 = scmp.lt.s32.totalorder %s669_s15, %s669_s15 }
  0x1d   :  { %p676_p13 = por %p675_p12, %p674_p11 }
  0x1f   :  { %p677_p0 = pnand %p676_p13, %p670_p10 }
  0x21   :  { %680 = shalt.err (!%p677_p0)
}
  0x22   :  { %s734_s1 = smov 64   ;;  %s735_s16 = smov 4  }
  0x23   :  { %51 = dma.hbm_to_vmem [thread:$0]  %s826_s3, 1024, %s46_s11, [#allocation6], %s734_s1, %s734_s1, %s735_s16  }
  0x24   :  { %s736_s19 = smov [#allocation8]  }
  0x25   :  { %s59_s20 = sshll.u32 %s736_s19, 4  ;;  %s60_s20 = int_to_ptr.vmem [resolvable:$true] %s59_s20 }
  0x26   :  { %s689_s21 = scalar_lea.vmem %s60_s20, 1024  ;;  %p694_p2 = scmp.lt.s32.totalorder %s60_s20, %s60_s20 }
  0x27   :  { %p690_p1 = scmp.ne.s32.totalorder %s60_s20, %s689_s21  ;;  %p695_p3 = scmp.lt.s32.totalorder %s689_s21, %s689_s21 }
  0x29   :  { %p696_p4 = por %p695_p3, %p694_p2 }
  0x2b   :  { %p697_p5 = pnand %p696_p4, %p690_p1 }
  0x2d   :  { %700 = shalt.err (!%p697_p5)
}
  0x2e   :  { %65 = dma.hbm_to_vmem [thread:$0]  %s828_s5, 1024, %s60_s20, [#allocation9], %s734_s1, %s734_s1, %s735_s16  }
  0x2f   :  { %721 = dma.done.wait [#allocation3], 128  }
  0x30   :  { %722 = vsyncadd [#allocation3], 4294967168 }
  0x31   :  { %723 = dma.done.wait [#allocation6], 3072  }
  0x32   :  { %724 = vsyncadd [#allocation6], 4294964224 }
  0x33   :  { %725 = dma.done.wait [#allocation9], 1024  }
  0x34   :  { %726 = vsyncadd [#allocation9], 4294966272  ;;  %v737_v0 = vmov 0   ;;  %v738_v1 = vmov 0.0   ;;  %v581_v2 = vld [vmem:[#allocation5 + $0x74] ss:$8 sps:$4 sm:$0xff]   ;;  %v101_v34 = vlaneseq }
  0x35   :  { %223 = vmatprep.mubr.bf16.mxu0 %v737_v0  ;;  %529 = vmatprep.subr.bf16.mxu1 %v738_v1  ;;  %v583_v3 = vld [vmem:[#allocation5 + $0x70] ss:$8 sps:$4 sm:$0xff]   ;;  %v584_v4 = vld [vmem:[#allocation5 + $0x64] ss:$8 sps:$4 sm:$0xff]   ;;  %v586_v5 = vld [vmem:[#allocation5 + $0x60] ss:$8 sps:$4 sm:$0xff]  }
  0x36   :  { %191 = vmatprep.subr.bf16.mxu0 %v581_v2  ;;  %v587_v6 = vld [vmem:[#allocation5 + $0x54] ss:$8 sps:$4 sm:$0xff]   ;;  %v589_v7 = vld [vmem:[#allocation5 + $0x50] ss:$8 sps:$4 sm:$0xff]   ;;  %v590_v8 = vld [vmem:[#allocation5 + $0x44] ss:$8 sps:$4 sm:$0xff]  }
  0x37   :  { %192 = vmatpush1.bf16.msra.mxu0 %v583_v3  ;;  %v592_v9 = vld [vmem:[#allocation5 + $0x40] ss:$8 sps:$4 sm:$0xff]   ;;  %v605_v10 = vld [vmem:[#allocation7 + $0x38] sm:$0xff]   ;;  %v606_v12 = vld [vmem:[#allocation7 + $0x30] sm:$0xff]   ;;  %vm739_vm0 = vmmov 0   ;;  %v102_v35 = vshrl.u32 %v101_v34, 7 }
  0x38   :  { %193 = vmatprep.subr.bf16.mxu0 %v584_v4  ;;  %v593_v11 = vld [vmem:[#allocation5 + $0x34] ss:$8 sps:$4 sm:$0xff]   ;;  %530 = vmatpush3.bf16.msra.mxu1 %v605_v10  ;;  %v595_v13 = vld [vmem:[#allocation5 + $0x30] ss:$8 sps:$4 sm:$0xff]   ;;  %v596_v14 = vld [vmem:[#allocation5 + $0x24] ss:$8 sps:$4 sm:$0xff]  }
  0x39   :  { %531 = vmatprep.subr.bf16.mxu1 %v738_v1  ;;  %v598_v15 = vld [vmem:[#allocation5 + $0x20] ss:$8 sps:$4 sm:$0xff]   ;;  %v599_v17 = vld [vmem:[#allocation5 + $0x14] ss:$8 sps:$4 sm:$0xff]   ;;  %v601_v19 = vld [vmem:[#allocation5 + $0x10] ss:$8 sps:$4 sm:$0xff]   ;;  %545 = vmatprep.mubr.msk.bf16.mxu1 %vm739_vm0, %v738_v1 }
  0x3a   :  { %v607_v16 = vld [vmem:[#allocation7 + $0x28] sm:$0xff]   ;;  %v608_v18 = vld [vmem:[#allocation7 + $0x20] sm:$0xff]   ;;  %v609_v21 = vld [vmem:[#allocation7 + $0x18] sm:$0xff]   ;;  %v103_v36 = vsub.s32 0, %v102_v35  ;;  %v107_v48 = vsub.s32 1, %v102_v35  ;;  %s740_s26 = smov [#allocation10]  }
  0x3b   :  { %194 = vmatpush1.bf16.msra.mxu0 %v586_v5  ;;  %v602_v20 = vld [vmem:[#allocation5 + $0x4] ss:$8 sps:$4 sm:$0xff]   ;;  %v604_v22 = vld [vmem:[#allocation5] ss:$8 sps:$4 sm:$0xff]   ;;  %v81_v23 = vld [vmem:[#allocation2] sm:$0xff]  ;;  %s466_s27 = sshll.u32 %s740_s26, 4  ;;  %s467_s27 = int_to_ptr.vmem [resolvable:$true] %s466_s27 }
  0x3c   :  { %195 = vmatprep.subr.bf16.mxu0 %v587_v6  ;;  %532 = vmatpush3.bf16.msra.mxu1 %v606_v12  ;;  %v610_v24 = vld [vmem:[#allocation7 + $0x10] sm:$0xff]   ;;  %v82_v25 = vpack.c.bf16 %v81_v23, %v81_v23  ;;  %v611_v26 = vld [vmem:[#allocation7 + $0x8] sm:$0xff]   ;;  %v612_v27 = vld [vmem:[#allocation7] sm:$0xff]   ;;  %p706_p7 = scmp.lt.s32.totalorder %s467_s27, %s467_s27 }
  0x3d   :  { %533 = vmatprep.subr.bf16.mxu1 %v738_v1  ;;  %v613_v28 = vld [vmem:[#allocation8 + $0x38] sm:$0xff]   ;;  %v614_v29 = vld [vmem:[#allocation8 + $0x30] sm:$0xff]   ;;  %v615_v30 = vld [vmem:[#allocation8 + $0x28] sm:$0xff]  }
  0x3e   :  { %v616_v31 = vld [vmem:[#allocation8 + $0x20] sm:$0xff]   ;;  %v617_v32 = vld [vmem:[#allocation8 + $0x18] sm:$0xff]   ;;  %v618_v33 = vld [vmem:[#allocation8 + $0x10] sm:$0xff]  }
  0x3f   :  { %196 = vmatpush1.bf16.msra.mxu0 %v589_v7  ;;  %v99_v37 = vld [vmem:[%s825_s2] sm:$0x3]  ;;  %v619_v46 = vld [vmem:[#allocation8 + $0x8] sm:$0xff]   ;;  %v620_v47 = vld [vmem:[#allocation8] sm:$0xff]  }
  0x40   :  { %197 = vmatprep.subr.bf16.mxu0 %v590_v8  ;;  %534 = vmatpush3.bf16.msra.mxu1 %v607_v16  ;;  %v104_v38 = vrot.slane %v99_v37, %v103_v36  ;;  %v493_v49 = vld [vmem:[%s827_s4] ss:$0 sm:$0xff]  ;;  %v108_v50 = vrot.slane %v99_v37, %v107_v48  ;;  %s701_s4 = scalar_lea.vmem %s467_s27, 128 }
  0x41   :  { %535 = vmatprep.subr.bf16.mxu1 %v738_v1  ;;  %v502_v60 = vld [vmem:[%s829_s6] ss:$0 sm:$0xff]  ;;  %p702_p6 = scmp.ne.s32.totalorder %s467_s27, %s701_s4  ;;  %p707_p8 = scmp.lt.s32.totalorder %s701_s4, %s701_s4 }
  0x43   :  { %198 = vmatpush1.bf16.msra.mxu0 %v592_v9  ;;  %p708_p9 = por %p707_p8, %p706_p7 }
  0x44   :  { %199 = vmatprep.subr.bf16.mxu0 %v593_v11  ;;  %536 = vmatpush3.bf16.msra.mxu1 %v608_v18 }
  0x45   :  { %537 = vmatprep.subr.bf16.mxu1 %v738_v1  ;;  %p709_p10 = pnand %p708_p9, %p702_p6 }
  0x47   :  { %200 = vmatpush1.bf16.msra.mxu0 %v595_v13 }
  0x48   :  { %201 = vmatprep.subr.bf16.mxu0 %v596_v14  ;;  %538 = vmatpush3.bf16.msra.mxu1 %v609_v21 }
  0x49   :  { %539 = vmatprep.subr.bf16.mxu1 %v738_v1 }
  0x4b   :  { %202 = vmatpush1.bf16.msra.mxu0 %v598_v15 }
  0x4c   :  { %203 = vmatprep.subr.bf16.mxu0 %v599_v17  ;;  %540 = vmatpush3.bf16.msra.mxu1 %v610_v24 }
  0x4d   :  { %541 = vmatprep.subr.bf16.mxu1 %v738_v1 }
  0x4f   :  { %204 = vmatpush1.bf16.msra.mxu0 %v601_v19 }
  0x50   :  { %205 = vmatprep.subr.bf16.mxu0 %v602_v20  ;;  %542 = vmatpush3.bf16.msra.mxu1 %v611_v26 }
  0x51   :  { %543 = vmatprep.subr.bf16.mxu1 %v738_v1 }
  0x53   :  { %206 = vmatpush1.bf16.msra.mxu0 %v604_v22 }
  0x54   :  { %549 = vmatprep.subr.bf16.mxu0 %v738_v1  ;;  %544 = vmatpush3.bf16.msra.mxu1 %v612_v27 }
  0x56   :  { %224 = vmatmul.mubr.bf16.vlgmr.msra.gmra.mxu0 %v82_v25 }
  0x57   :  { %565 = vmatprep.mubr.msk.bf16.mxu0 %vm739_vm0, %v738_v1  ;;  %550 = vmatpush3.bf16.msra.mxu0 %v613_v28 }
  0x58   :  { %551 = vmatprep.subr.bf16.mxu0 %v738_v1 }
  0x5b   :  { %552 = vmatpush3.bf16.msra.mxu0 %v614_v29 }
  0x5c   :  { %553 = vmatprep.subr.bf16.mxu0 %v738_v1 }
  0x5f   :  { %554 = vmatpush3.bf16.msra.mxu0 %v615_v30 }
  0x60   :  { %555 = vmatprep.subr.bf16.mxu0 %v738_v1 }
  0x63   :  { %556 = vmatpush3.bf16.msra.mxu0 %v616_v31 }
  0x64   :  { %557 = vmatprep.subr.bf16.mxu0 %v738_v1 }
  0x67   :  { %558 = vmatpush3.bf16.msra.mxu0 %v617_v32 }
  0x68   :  { %559 = vmatprep.subr.bf16.mxu0 %v738_v1 }
  0x6b   :  { %560 = vmatpush3.bf16.msra.mxu0 %v618_v33 }
  0x6c   :  { %561 = vmatprep.subr.bf16.mxu0 %v738_v1 }
  0x6f   :  { %562 = vmatpush3.bf16.msra.mxu0 %v619_v46 }
  0x70   :  { %563 = vmatprep.subr.bf16.mxu0 %v738_v1 }
  0x73   :  { %564 = vmatpush3.bf16.msra.mxu0 %v620_v47 }
 0x116   :  { %v225_v39 = vpop.f32.mrf.mxu0 }
 0x117   :  { %v226_v40 = vadd.f32 %v225_v39, %v104_v38 }
 0x118   :  { %v227_v41 = vpop.f32.mrf.mxu0 }
 0x119   :  { %v232_v42 = vmax.f32 %v226_v40, 0.0  ;;  %v228_v54 = vadd.f32 %v227_v41, %v108_v50 }
 0x11a   :  { %v229_v43 = vpop.f32.mrf.mxu0 }
 0x11b   :  { %v233_v44 = vpack.c.bf16 %v232_v42, %v232_v42 }
 0x11c   :  { %v230_v45 = vpop.f32.mrf.mxu0 }
 0x11d   :  { %546 = vmatmul.mubr.bf16.vlgmr.msra.gmra.mxu1 %v233_v44 }
 0x1dd   :  { %v339_v51 = vpop.f32.mrf.mxu1 }
 0x1de   :  { %v340_v52 = vadd.f32 %v493_v49, %v339_v51 }
 0x1df   :  { %v547_v53 = vpop.f32.mrf.mxu1 }
 0x1e0   :  { %v345_v55 = vmax.f32 %v340_v52, 0.0 }
 0x1e1   :  { %v342_v56 = vpop.f32.mrf.mxu1 }
 0x1e2   :  { %v346_v57 = vadd.f32 %v345_v55, %v228_v54 }
 0x1e3   :  { %v548_v58 = vpop.f32.mrf.mxu1 }
 0x1e4   :  { %v347_v59 = vpack.c.bf16 %v346_v57, %v346_v57 }
 0x1e6   :  { %566 = vmatmul.mubr.bf16.vlgmr.msra.gmra.mxu0 %v347_v59 }
 0x2a6   :  { %v453_v61 = vpop.f32.mrf.mxu0 }
 0x2a7   :  { %v454_v62 = vadd.f32 %v502_v60, %v453_v61 }
 0x2a8   :  { %v567_v63 = vpop.f32.mrf.mxu0 }
 0x2a9   :  { %459 = vst [vmem:[#allocation10] sm:$0xff] %v454_v62 }
 0x2aa   :  { %v456_v0 = vpop.f32.mrf.mxu0 }
 0x2ab   :  { %712 = shalt.err (!%p709_p10)
}
 0x2ac   :  { %469 = dma.vmem_to_hbm [thread:$0]  %s467_s27, 128, %s830_s7, [#allocation4]   ;;  %v568_v1 = vpop.f32.mrf.mxu0 }
 0x2ad   :  { %727 = dma.done.wait [#allocation4], 128  }
 0x2ae   :  { %728 = vsyncadd [#allocation4], 4294967168 }
 0x2af   :  { %473 = vsyncpa [#allocation3], 1 }
 0x2b0   :  { %474 = vsyncpa [#allocation6], 1 }
 0x2b1   :  { %475 = vsyncpa [#allocation9], 1 }
 0x2b2   :  { %476 = vsyncpa [#allocation4], 1 }

</bundles_post_ra>
